<compile_context>
chip_gen: v6e
topology: v6e:2x2x1
jax: 0.10.0
libtpu: 0.0.40
codegen_flags: <defaults>
</compile_context>

<pallas_src>
import math

import jax
import jax.numpy as jnp
from jax.experimental import pallas as pl
from jax.experimental.pallas import tpu as pltpu


def _round_up(x, m):
    return ((x + m - 1) // m) * m


def _cdiv(a, b):
    return (a + b - 1) // b


def _choose_tiling(batch, tm, min_grid_steps):
    """Pick (tile_rows, padded_batch).

    Default: one whole-batch grid step (best on single-TC v5e/v6e) up to 4K
    rows; beyond that, ~2K-row tiles.  Pass min_grid_steps=2 on v7x so the
    "parallel" grid shards across both TensorCores.  Whenever the grid has
    more than one step the tile is forced to a multiple of 128 so the (1, tm)
    output block stays lane-aligned (unmasked stores, coalesced DMA).
    """
    bp = _round_up(batch, 8)
    if tm is None:
        if min_grid_steps <= 1 and bp <= 4096:
            tm = bp                                   # whole batch, grid=(1,)
        else:
            steps = max(min_grid_steps, _cdiv(bp, 2048))
            tm = _round_up(_cdiv(bp, steps), 128)
    if tm >= bp:
        tm = bp                                       # single step
    else:
        tm = _round_up(tm, 128)                       # lane-aligned tiles
    return tm, _round_up(batch, tm)


def critic_kernel(x_ref,
                  w1_ref, b1_ref,
                  w2_ref, b2_ref,
                  w3_ref, b3_ref,
                  wq_ref, bq_ref,
                  out_ref):
    cdt = w1_ref.dtype  # MXU operand dtype (f32 default; bf16 optional on v6e/v7x)

    # Hidden layers: relu(h @ W + b) with f32 accumulation on the MXU.
    h = jnp.dot(x_ref[...].astype(cdt), w1_ref[...],
                preferred_element_type=jnp.float32) + b1_ref[...]
    h = jnp.maximum(h, 0.0)
    h = jnp.dot(h.astype(cdt), w2_ref[...],
                preferred_element_type=jnp.float32) + b2_ref[...]
    h = jnp.maximum(h, 0.0)
    h = jnp.dot(h.astype(cdt), w3_ref[...],
                preferred_element_type=jnp.float32) + b3_ref[...]
    h = jnp.maximum(h, 0.0)

    # q head (out_features = 1), produced lane-dense: contract wq_row (1, D3)
    # against h (tm, D3) on their last dims -> (1, tm) row.  This keeps the
    # output block unmasked/lane-dense (no (tm,1) vst.msk partial stores) and
    # needs no relayout; the one extra tiny MXU pass is free -- this kernel is
    # overhead/DMA bound, not MXU bound.
    q = jax.lax.dot_general(
        wq_ref[...], h,
        dimension_numbers=(((1,), (1,)), ((), ())),
        preferred_element_type=jnp.float32) + bq_ref[...]
    out_ref[...] = q.astype(out_ref.dtype)


def prepare_params(params, compute_dtype=jnp.float32):
    """One-time parameter prep (call ONCE at setup, not per forward).

    Hidden-layer weights -> compute_dtype (MXU operand dtype; keep f32 on v5e,
    bf16 is an option on v6e/v7x).  Biases and the q head stay f32 -- they feed
    the f32 accumulators.  Returns the flat kernel argument tuple.
    """
    (w1, b1), (w2, b2), (w3, b3), (wq, bq) = params
    return (w1.astype(compute_dtype), b1.astype(jnp.float32),
            w2.astype(compute_dtype), b2.astype(jnp.float32),
            w3.astype(compute_dtype), b3.astype(jnp.float32),
            wq.reshape(1, -1).astype(jnp.float32),   # (1, D3) row for the q head
            bq.reshape(1, 1).astype(jnp.float32))    # (1, 1)


def critic_forward(state_action, prepared_params, *, tm=None, min_grid_steps=1):
    """state_action: [B, state_size + action_size] (passed straight to the
    kernel -- no wrapper-side cast).  prepared_params: output of
    prepare_params().  On v7x pass min_grid_steps=2 to keep >=2 parallel grid
    steps; on v5e/v6e the default single whole-batch step is best.
    """
    w1, b1, w2, b2, w3, b3, wq_row, bq = prepared_params
    B, F = state_action.shape

    tm, Bp = _choose_tiling(B, tm, min_grid_steps)

    x = state_action
    if Bp != B:
        x = jnp.pad(x, ((0, Bp - B), (0, 0)))   # padded rows sliced off below

    param_args = (w1, b1, w2, b2, w3, b3, wq_row, bq)

    # Weights / biases: full-array blocks with a constant index_map -> DMA'd
    # once and resident in VMEM for every grid step (~50 KB total).
    def resident(a):
        return pl.BlockSpec(a.shape, lambda i: (0,) * a.ndim)

    out = pl.pallas_call(
        critic_kernel,
        out_shape=jax.ShapeDtypeStruct((1, Bp), jnp.float32),
        grid=(Bp // tm,),
        in_specs=[pl.BlockSpec((tm, F), lambda i: (i, 0))]
                 + [resident(a) for a in param_args],
        # Lane-dense output: one (1, tm) row block per grid step.
        out_specs=pl.BlockSpec((1, tm), lambda i: (0, i)),
        compiler_params=pltpu.CompilerParams(
            dimension_semantics=("parallel",)),
    )(x, *param_args)

    # (1, Bp) row -> (B, 1) column, dropping any padded rows.
    return out.reshape(Bp, 1)[:B]


def init_params(key, state_size, action_size, layers):
    """Deterministic parameter init mirroring the PyTorch module:
       - hidden layers: kaiming_normal_(fan_out, relu) weights, bias = 0.1
       - q head: PyTorch default Linear init (uniform +-1/sqrt(fan_in))
       Weights are stored transposed as (in_features, out_features)."""
    dims_in = [state_size + action_size, layers[0], layers[1]]
    dims_out = [layers[0], layers[1], layers[2]]
    params = []
    keys = jax.random.split(key, 5)
    for i, (din, dout) in enumerate(zip(dims_in, dims_out)):
        std = math.sqrt(2.0) / math.sqrt(dout)   # kaiming_normal_, fan_out, relu
        w = std * jax.random.normal(keys[i], (din, dout), dtype=jnp.float32)
        b = jnp.full((1, dout), 0.1, dtype=jnp.float32)
        params.append((w, b))
    din, dout = layers[2], 1                      # q head: default nn.Linear init
    bound = 1.0 / math.sqrt(din)
    wq = jax.random.uniform(keys[3], (din, dout), jnp.float32, -bound, bound)
    bq = jax.random.uniform(keys[4], (1, dout), jnp.float32, -bound, bound)
    params.append((wq, bq))
    return params


def critic_reference(state_action, params):
    """Pure-JAX f32 reference for correctness checks."""
    x = state_action
    for i, (w, b) in enumerate(params):
        x = jnp.dot(x, w) + b
        if i < len(params) - 1:
            x = jnp.maximum(x, 0.0)
    return x


if __name__ == "__main__":
    # Shapes consistent with the module: state_size=8, action_size=4,
    # layers=[128, 64, 32].  (LayerNorms exist in __init__ but are unused in
    # forward(), so they are intentionally not part of the kernel.)
    STATE_SIZE, ACTION_SIZE = 8, 4
    LAYERS = [128, 64, 32]

    key = jax.random.PRNGKey(0)
    k_params, k_x = jax.random.split(key)
    raw_params = init_params(k_params, STATE_SIZE, ACTION_SIZE, LAYERS)
    params_f32 = prepare_params(raw_params, jnp.float32)

    # --- small batch, whole-batch single grid step (v5e/v6e default path) ----
    B0 = 16
    x0 = jax.random.normal(k_x, (B0, STATE_SIZE + ACTION_SIZE), jnp.float32)
    q0 = jax.block_until_ready(critic_forward(x0, params_f32))
    ref0 = critic_reference(x0, raw_params)
    assert q0.shape == (B0, 1)
    assert jnp.allclose(q0, ref0, atol=1e-4, rtol=1e-4), f"{q0} vs {ref0}"

    # --- non-8-multiple batch exercises the padding path ---------------------
    B1 = 10
    q1 = jax.block_until_ready(critic_forward(x0[:B1], params_f32))
    assert q1.shape == (B1, 1)
    assert jnp.allclose(q1, ref0[:B1], atol=1e-4, rtol=1e-4)

    # --- multi-step "parallel" grid (v7x-style: >=2 steps over two TCs) ------
    B2 = 256
    x2 = jax.random.normal(jax.random.fold_in(k_x, 1),
                           (B2, STATE_SIZE + ACTION_SIZE), jnp.float32)
    q2 = jax.block_until_ready(
        critic_forward(x2, params_f32, min_grid_steps=2))
    ref2 = critic_reference(x2, raw_params)
    assert q2.shape == (B2, 1)
    assert jnp.allclose(q2, ref2, atol=1e-4, rtol=1e-4)

    # --- optional bf16-weight path (v6e/v7x); error compounds across the 3
    #     hidden layers, hence the loose tolerance ----------------------------
    params_bf16 = prepare_params(raw_params, jnp.bfloat16)
    q3 = jax.block_until_ready(critic_forward(x2, params_bf16))
    assert q3.shape == (B2, 1)
    assert float(jnp.max(jnp.abs(q3 - ref2))) < 1e-1

    print("KERNEL_OK")
</pallas_src>

<mosaic_0001>
module attributes {stable_mosaic.version = 11 : i64} {
  func.func @critic_kernel(%arg0: i32, %arg1: memref<16x12xf32, #tpu.memory_space<vmem>>, %arg2: memref<12x128xf32, #tpu.memory_space<vmem>>, %arg3: memref<1x128xf32, #tpu.memory_space<vmem>>, %arg4: memref<128x64xf32, #tpu.memory_space<vmem>>, %arg5: memref<1x64xf32, #tpu.memory_space<vmem>>, %arg6: memref<64x32xf32, #tpu.memory_space<vmem>>, %arg7: memref<1x32xf32, #tpu.memory_space<vmem>>, %arg8: memref<1x32xf32, #tpu.memory_space<vmem>>, %arg9: memref<1x1xf32, #tpu.memory_space<vmem>>, %arg10: memref<1x16xf32, #tpu.memory_space<vmem>>) attributes {dimension_semantics = [#tpu.dimension_semantics<parallel>], iteration_bounds = array<i64: 1>, scalar_prefetch = 0 : i64, scratch_operands = 0 : i64, tpu.core_type = #tpu.core_type<tc>, window_params = [{transform_indices = @transform_0, window_bounds = array<i64: 16, 12>}, {pipeline_mode = #tpu.pipeline_mode<synchronous>, transform_indices = @transform_1, window_bounds = array<i64: 12, 128>}, {pipeline_mode = #tpu.pipeline_mode<synchronous>, transform_indices = @transform_2, window_bounds = array<i64: 1, 128>}, {pipeline_mode = #tpu.pipeline_mode<synchronous>, transform_indices = @transform_3, window_bounds = array<i64: 128, 64>}, {pipeline_mode = #tpu.pipeline_mode<synchronous>, transform_indices = @transform_4, window_bounds = array<i64: 1, 64>}, {pipeline_mode = #tpu.pipeline_mode<synchronous>, transform_indices = @transform_5, window_bounds = array<i64: 64, 32>}, {pipeline_mode = #tpu.pipeline_mode<synchronous>, transform_indices = @transform_6, window_bounds = array<i64: 1, 32>}, {pipeline_mode = #tpu.pipeline_mode<synchronous>, transform_indices = @transform_7, window_bounds = array<i64: 1, 32>}, {pipeline_mode = #tpu.pipeline_mode<synchronous>, transform_indices = @transform_8, window_bounds = array<i64: 1, 1>}, {transform_indices = @transform_9, window_bounds = array<i64: 1, 16>}]} {
    %c0 = arith.constant 0 : index
    %c0_0 = arith.constant 0 : index
    %0 = vector.load %arg1[%c0, %c0_0] : memref<16x12xf32, #tpu.memory_space<vmem>>, vector<16x12xf32>
    %c0_1 = arith.constant 0 : index
    %c0_2 = arith.constant 0 : index
    %1 = vector.load %arg2[%c0_1, %c0_2] : memref<12x128xf32, #tpu.memory_space<vmem>>, vector<12x128xf32>
    %cst = arith.constant dense<0.000000e+00> : vector<16x128xf32>
    %2 = tpu.matmul %0, %1, %cst {dimension_numbers = #tpu.dot_dimension_numbers<[1], [0], [0], [1], [0, 0, 1, 1], [], []>} : vector<16x12xf32>, vector<12x128xf32>, vector<16x128xf32> -> vector<16x128xf32>
    %c0_3 = arith.constant 0 : index
    %c0_4 = arith.constant 0 : index
    %3 = vector.load %arg3[%c0_3, %c0_4] : memref<1x128xf32, #tpu.memory_space<vmem>>, vector<1x128xf32>
    %4 = vector.broadcast %3 : vector<1x128xf32> to vector<16x128xf32>
    %5 = arith.addf %2, %4 : vector<16x128xf32>
    %cst_5 = arith.constant 0.000000e+00 : f32
    %6 = vector.broadcast %cst_5 : f32 to vector<16x128xf32>
    %7 = arith.maximumf %5, %6 : vector<16x128xf32>
    %c0_6 = arith.constant 0 : index
    %c0_7 = arith.constant 0 : index
    %8 = vector.load %arg4[%c0_6, %c0_7] : memref<128x64xf32, #tpu.memory_space<vmem>>, vector<128x64xf32>
    %cst_8 = arith.constant dense<0.000000e+00> : vector<16x64xf32>
    %9 = tpu.matmul %7, %8, %cst_8 {dimension_numbers = #tpu.dot_dimension_numbers<[1], [0], [0], [1], [0, 0, 1, 1], [], []>} : vector<16x128xf32>, vector<128x64xf32>, vector<16x64xf32> -> vector<16x64xf32>
    %c0_9 = arith.constant 0 : index
    %c0_10 = arith.constant 0 : index
    %10 = vector.load %arg5[%c0_9, %c0_10] : memref<1x64xf32, #tpu.memory_space<vmem>>, vector<1x64xf32>
    %11 = vector.broadcast %10 : vector<1x64xf32> to vector<16x64xf32>
    %12 = arith.addf %9, %11 : vector<16x64xf32>
    %cst_11 = arith.constant 0.000000e+00 : f32
    %13 = vector.broadcast %cst_11 : f32 to vector<16x64xf32>
    %14 = arith.maximumf %12, %13 : vector<16x64xf32>
    %c0_12 = arith.constant 0 : index
    %c0_13 = arith.constant 0 : index
    %15 = vector.load %arg6[%c0_12, %c0_13] : memref<64x32xf32, #tpu.memory_space<vmem>>, vector<64x32xf32>
    %cst_14 = arith.constant dense<0.000000e+00> : vector<16x32xf32>
    %16 = tpu.matmul %14, %15, %cst_14 {dimension_numbers = #tpu.dot_dimension_numbers<[1], [0], [0], [1], [0, 0, 1, 1], [], []>} : vector<16x64xf32>, vector<64x32xf32>, vector<16x32xf32> -> vector<16x32xf32>
    %c0_15 = arith.constant 0 : index
    %c0_16 = arith.constant 0 : index
    %17 = vector.load %arg7[%c0_15, %c0_16] : memref<1x32xf32, #tpu.memory_space<vmem>>, vector<1x32xf32>
    %18 = vector.broadcast %17 : vector<1x32xf32> to vector<16x32xf32>
    %19 = arith.addf %16, %18 : vector<16x32xf32>
    %cst_17 = arith.constant 0.000000e+00 : f32
    %20 = vector.broadcast %cst_17 : f32 to vector<16x32xf32>
    %21 = arith.maximumf %19, %20 : vector<16x32xf32>
    %c0_18 = arith.constant 0 : index
    %c0_19 = arith.constant 0 : index
    %22 = vector.load %arg8[%c0_18, %c0_19] : memref<1x32xf32, #tpu.memory_space<vmem>>, vector<1x32xf32>
    %cst_20 = arith.constant dense<0.000000e+00> : vector<1x16xf32>
    %23 = tpu.matmul %22, %21, %cst_20 {dimension_numbers = #tpu.dot_dimension_numbers<[1], [1], [0], [0], [0, 0, 1, 0], [], []>} : vector<1x32xf32>, vector<16x32xf32>, vector<1x16xf32> -> vector<1x16xf32>
    %c0_21 = arith.constant 0 : index
    %c0_22 = arith.constant 0 : index
    %24 = vector.load %arg9[%c0_21, %c0_22] : memref<1x1xf32, #tpu.memory_space<vmem>>, vector<1x1xf32>
    %25 = vector.broadcast %24 : vector<1x1xf32> to vector<1x16xf32>
    %26 = arith.addf %23, %25 : vector<1x16xf32>
    %c0_23 = arith.constant 0 : index
    %c0_24 = arith.constant 0 : index
    %27 = vector.load %arg10[%c0_23, %c0_24] : memref<1x16xf32, #tpu.memory_space<vmem>>, vector<1x16xf32>
    tpu.vector_store %arg10[%c0_23, %c0_24], %26 {strides = array<i32>} : memref<1x16xf32, #tpu.memory_space<vmem>>, vector<1x16xf32>,
    return
  }
  func.func @transform_0(%arg0: i32) -> (i32, i32) {
    %c0_i32 = arith.constant 0 : i32
    %c0_i32_0 = arith.constant 0 : i32
    return %arg0, %c0_i32 : i32, i32
  }
  func.func @transform_1(%arg0: i32) -> (i32, i32) {
    %c0_i32 = arith.constant 0 : i32
    %c0_i32_0 = arith.constant 0 : i32
    %c0_i32_1 = arith.constant 0 : i32
    return %c0_i32, %c0_i32_0 : i32, i32
  }
  func.func @transform_2(%arg0: i32) -> (i32, i32) {
    %c0_i32 = arith.constant 0 : i32
    %c0_i32_0 = arith.constant 0 : i32
    %c0_i32_1 = arith.constant 0 : i32
    return %c0_i32, %c0_i32_0 : i32, i32
  }
  func.func @transform_3(%arg0: i32) -> (i32, i32) {
    %c0_i32 = arith.constant 0 : i32
    %c0_i32_0 = arith.constant 0 : i32
    %c0_i32_1 = arith.constant 0 : i32
    return %c0_i32, %c0_i32_0 : i32, i32
  }
  func.func @transform_4(%arg0: i32) -> (i32, i32) {
    %c0_i32 = arith.constant 0 : i32
    %c0_i32_0 = arith.constant 0 : i32
    %c0_i32_1 = arith.constant 0 : i32
    return %c0_i32, %c0_i32_0 : i32, i32
  }
  func.func @transform_5(%arg0: i32) -> (i32, i32) {
    %c0_i32 = arith.constant 0 : i32
    %c0_i32_0 = arith.constant 0 : i32
    %c0_i32_1 = arith.constant 0 : i32
    return %c0_i32, %c0_i32_0 : i32, i32
  }
  func.func @transform_6(%arg0: i32) -> (i32, i32) {
    %c0_i32 = arith.constant 0 : i32
    %c0_i32_0 = arith.constant 0 : i32
    %c0_i32_1 = arith.constant 0 : i32
    return %c0_i32, %c0_i32_0 : i32, i32
  }
  func.func @transform_7(%arg0: i32) -> (i32, i32) {
    %c0_i32 = arith.constant 0 : i32
    %c0_i32_0 = arith.constant 0 : i32
    %c0_i32_1 = arith.constant 0 : i32
    return %c0_i32, %c0_i32_0 : i32, i32
  }
  func.func @transform_8(%arg0: i32) -> (i32, i32) {
    %c0_i32 = arith.constant 0 : i32
    %c0_i32_0 = arith.constant 0 : i32
    %c0_i32_1 = arith.constant 0 : i32
    return %c0_i32, %c0_i32_0 : i32, i32
  }
  func.func @transform_9(%arg0: i32) -> (i32, i32) {
    %c0_i32 = arith.constant 0 : i32
    %c0_i32_0 = arith.constant 0 : i32
    return %c0_i32, %arg0 : i32, i32
  }
}

</mosaic_0001>

<bundles_post_ra>
// kernel: tpu_custom_call.1
= control target key start
LH: loop header
LB: loop body
LE: loop exit
PB: predicated region body
PF: predicated region fallthrough
CT: control target
= control target key end

     0   :  { %s737_s0 = inlined_call_operand.vmem [shape: f32[16,12], index: 0, kind: input, shape index: {}]   ;;  %s738_s1 = inlined_call_operand.vmem [shape: f32[12,128], index: 1, kind: input, shape index: {}]   ;;  %s739_s2 = inlined_call_operand.vmem [shape: f32[1,128], index: 2, kind: input, shape index: {}]   ;;  %s740_s3 = inlined_call_operand.vmem [shape: f32[128,64], index: 3, kind: input, shape index: {}]   ;;  %s741_s4 = inlined_call_operand.vmem [shape: f32[1,64], index: 4, kind: input, shape index: {}]   ;;  %s742_s5 = inlined_call_operand.vmem [shape: f32[64,32], index: 5, kind: input, shape index: {}]   ;;  %s743_s6 = inlined_call_operand.vmem [shape: f32[1,32], index: 6, kind: input, shape index: {}]   ;;  %s744_s7 = inlined_call_operand.vmem [shape: f32[1,32], index: 7, kind: input, shape index: {}]   ;;  %s745_s8 = inlined_call_operand.<no memory space> [shape: f32[1,1], index: 8, kind: input, shape index: {}]   ;;  %s746_s9 = inlined_call_operand.hbm [shape: f32[1,16], index: 9, kind: output, shape index: {}]  }
   0x1   :  { %v14_v0 = vstv %s745_s8 }
   0x2   :  { %15 = vst [vmem:[#allocation2] sm:$0x1] %v14_v0 }
   0x3   :  { %v38_v1 = vld [vmem:[%s738_s1 + $0x8] sm:$0xf]  ;;  %vm53_vm0 = vcmask 1043456   ;;  %v37_v2 = vld [vmem:[%s738_s1] sm:$0xff]  ;;  %vm46_vm1 = vcmask 97280   ;;  %v149_v4 = vld [vmem:[%s740_s3 + $0x78] sm:$0xff] }
   0x4   :  { %v35_v3 = vld [vmem:[%s737_s0] sm:$0xff]  ;;  %486 = vmatprep.subr.msk.mxu0 %vm53_vm0, %v38_v1  ;;  %v148_v5 = vld [vmem:[%s740_s3 + $0x70] sm:$0xff]  ;;  %v36_v6 = vld [vmem:[%s737_s0 + $0x8] sm:$0xff]  ;;  %493 = vmatprep.subr.mxu1 %v149_v4 }
   0x5   :  { %490 = vmatprep.mubr.msk.f32.mxu0 %vm46_vm1, %v35_v3  ;;  %487 = vmatpush3.msk.msra.mxu0 %vm53_vm0, %v38_v1  ;;  %v147_v7 = vld [vmem:[%s740_s3 + $0x68] sm:$0xff]  ;;  %v146_v8 = vld [vmem:[%s740_s3 + $0x60] sm:$0xff] }
   0x6   :  { %488 = vmatprep.subr.mxu0 %v37_v2  ;;  %494 = vmatpush3.msra.mxu1 %v149_v4 }
   0x7   :  { %489 = vmatpush3.msra.mxu0 %v37_v2  ;;  %495 = vmatprep.subr.mxu1 %v148_v5 }
   0x8   :  { %491 = vmatmul.mubr.msk.f32.vlgmr.msra.gmra.mxu0 %vm46_vm1, %v36_v6  ;;  %496 = vmatpush3.msra.mxu1 %v148_v5 }
   0x9   :  { %16 = vsyncpa [#allocation4], 0  ;;  %497 = vmatprep.subr.mxu1 %v147_v7  ;;  %v145_v9 = vld [vmem:[%s740_s3 + $0x58] sm:$0xff]  ;;  %v144_v10 = vld [vmem:[%s740_s3 + $0x50] sm:$0xff]  ;;  %vm249_vm2 = vcmask 523264   ;;  %v581_v43 = vmov 0.0   ;;  %v340_v54 = vlaneseq }
   0xa   :  { %498 = vmatpush3.msra.mxu1 %v147_v7  ;;  %v143_v11 = vld [vmem:[%s740_s3 + $0x48] sm:$0xff]  ;;  %v142_v12 = vld [vmem:[%s740_s3 + $0x40] sm:$0xff]  ;;  %v141_v13 = vld [vmem:[%s740_s3 + $0x38] sm:$0xff]  ;;  %vm582_vm3 = vmmov 0   ;;  %v583_v45 = vmov 0   ;;  %vm344_vm4 = vcmask 261120  }
   0xb   :  { %499 = vmatprep.subr.mxu1 %v146_v8  ;;  %v140_v14 = vld [vmem:[%s740_s3 + $0x30] sm:$0xff]  ;;  %v139_v15 = vld [vmem:[%s740_s3 + $0x28] sm:$0xff]  ;;  %v138_v16 = vld [vmem:[%s740_s3 + $0x20] sm:$0xff]  ;;  %558 = vset.pattern.permute.xlu0 %v583_v45  ;;  %v341_v55 = vshrl.u32 %v340_v54, 7  ;;  %vm424_vm5 = vcmask 122880  }
   0xc   :  { %500 = vmatpush3.msra.mxu1 %v146_v8  ;;  %v137_v17 = vld [vmem:[%s740_s3 + $0x18] sm:$0xff]  ;;  %v136_v18 = vld [vmem:[%s740_s3 + $0x10] sm:$0xff]  ;;  %v135_v19 = vld [vmem:[%s740_s3 + $0x8] sm:$0xff] }
   0xd   :  { %501 = vmatprep.subr.mxu1 %v145_v9  ;;  %v134_v20 = vld [vmem:[%s740_s3] sm:$0xff]  ;;  %v241_v21 = vld [vmem:[%s742_s5 + $0x38] sm:$0xff]  ;;  %v240_v22 = vld [vmem:[%s742_s5 + $0x30] sm:$0xff]  ;;  %v342_v56 = vsub.s32 0, %v341_v55 }
   0xe   :  { %502 = vmatpush3.msra.mxu1 %v145_v9  ;;  %528 = vmatprep.subr.mxu0 %v241_v21  ;;  %v239_v23 = vld [vmem:[%s742_s5 + $0x28] sm:$0xff]  ;;  %v238_v24 = vld [vmem:[%s742_s5 + $0x20] sm:$0xff]  ;;  %v237_v32 = vld [vmem:[%s742_s5 + $0x18] sm:$0xff] }
   0xf   :  { %503 = vmatprep.subr.mxu1 %v144_v10  ;;  %529 = vmatpush3.msra.mxu0 %v241_v21  ;;  %v440_v25 = vld [vmem:[%s739_s2] ss:$0 sm:$0xff]  ;;  %v236_v33 = vld [vmem:[%s742_s5 + $0x10] sm:$0xff]  ;;  %v235_v34 = vld [vmem:[%s742_s5 + $0x8] sm:$0xff] }
  0x10   :  { %504 = vmatpush3.msra.mxu1 %v144_v10  ;;  %530 = vmatprep.subr.mxu0 %v240_v22  ;;  %v234_v35 = vld [vmem:[%s742_s5] sm:$0xff] }
  0x11   :  { %505 = vmatprep.subr.mxu1 %v143_v11  ;;  %531 = vmatpush3.msra.mxu0 %v240_v22  ;;  %v444_v36 = vld [vmem:[%s741_s4] ss:$0 sm:$0xff] }
  0x12   :  { %506 = vmatpush3.msra.mxu1 %v143_v11  ;;  %532 = vmatprep.subr.mxu0 %v239_v23  ;;  %v334_v44 = vld [vmem:[#allocation2] sm:$0x1] }
  0x13   :  { %507 = vmatprep.subr.mxu1 %v142_v12  ;;  %533 = vmatpush3.msra.mxu0 %v239_v23  ;;  %v445_v46 = vld [vmem:[%s743_s6] ss:$0 sm:$0xff]  ;;  %s584_s6 = smov [#allocation3]  }
  0x14   :  { %508 = vmatpush3.msra.mxu1 %v142_v12  ;;  %534 = vmatprep.subr.mxu0 %v238_v24  ;;  %v333_v53 = vld [vmem:[%s744_s7] sm:$0x1]  ;;  %s432_s1 = sshll.u32 %s584_s6, 4  ;;  %s433_s1 = int_to_ptr.vmem [resolvable:$true] %s432_s1 }
  0x15   :  { %509 = vmatprep.subr.mxu1 %v141_v13  ;;  %535 = vmatpush3.msra.mxu0 %v238_v24  ;;  %s559_s22 = scalar_lea.vmem %s433_s1, 16  ;;  %s563_s23 = scalar_lea.vmem %s433_s1, 32 }
  0x16   :  { %510 = vmatpush3.msra.mxu1 %v141_v13  ;;  %536 = vmatprep.subr.mxu0 %v237_v32  ;;  %p560_p0 = scmp.ne.s32.totalorder %s433_s1, %s559_s22  ;;  %p564_p1 = scmp.lt.s32.totalorder %s433_s1, %s433_s1 }
  0x17   :  { %511 = vmatprep.subr.mxu1 %v140_v14  ;;  %537 = vmatpush3.msra.mxu0 %v237_v32  ;;  %p565_p2 = scmp.lt.s32.totalorder %s563_s23, %s559_s22 }
  0x18   :  { %512 = vmatpush3.msra.mxu1 %v140_v14  ;;  %538 = vmatprep.subr.mxu0 %v236_v33 }
  0x19   :  { %513 = vmatprep.subr.mxu1 %v139_v15  ;;  %539 = vmatpush3.msra.mxu0 %v236_v33  ;;  %p566_p3 = por %p565_p2, %p564_p1 }
  0x1a   :  { %514 = vmatpush3.msra.mxu1 %v139_v15  ;;  %540 = vmatprep.subr.mxu0 %v235_v34 }
  0x1b   :  { %515 = vmatprep.subr.mxu1 %v138_v16  ;;  %541 = vmatpush3.msra.mxu0 %v235_v34  ;;  %p567_p4 = pnand %p566_p3, %p560_p0 }
  0x1c   :  { %516 = vmatpush3.msra.mxu1 %v138_v16  ;;  %542 = vmatprep.subr.mxu0 %v234_v35 }
  0x1d   :  { %517 = vmatprep.subr.mxu1 %v137_v17  ;;  %543 = vmatpush3.msra.mxu0 %v234_v35 }
  0x1e   :  { %518 = vmatpush3.msra.mxu1 %v137_v17  ;;  %547 = vmatprep.subr.mxu0 %v581_v43 }
  0x1f   :  { %519 = vmatprep.subr.mxu1 %v136_v18  ;;  %337 = vperm.xlu0 %558, %v334_v44  }
  0x20   :  { %520 = vmatpush3.msra.mxu1 %v136_v18 }
  0x21   :  { %521 = vmatprep.subr.mxu1 %v135_v19 }
  0x22   :  { %522 = vmatpush3.msra.mxu1 %v135_v19 }
  0x23   :  { %523 = vmatprep.subr.mxu1 %v134_v20 }
  0x24   :  { %524 = vmatpush3.msra.mxu1 %v134_v20 }
  0x9a   :  { %v338_v57 = vpop.permute.xlu0 %337 }
  0x9b   :  { %v343_v58 = vrot.slane %v338_v57, %v342_v56 }
  0xc8   :  { %v492_v26 = vpop.f32.mrf.mxu0 }
  0xc9   :  { %v129_v27 = vadd.f32 %v492_v26, %v440_v25 }
  0xca   :  { %v123_v28 = vpop.f32.mrf.mxu0 }
  0xcb   :  { %v124_v29 = vadd.f32 %v440_v25, %v123_v28  ;;  %v133_v31 = vmax.f32 %v129_v27, 0.0 }
  0xcd   :  { %v132_v30 = vmax.f32 %v124_v29, 0.0 }
  0xcf   :  { %525 = vmatprep.mubr.f32.mxu1 %v132_v30 }
  0xd0   :  { %526 = vmatmul.mubr.f32.vlgmr.msra.gmra.mxu1 %v133_v31 }
 0x190   :  { %v527_v37 = vpop.f32.mrf.mxu1 }
 0x191   :  { %v229_v38 = vadd.f32 %v527_v37, %v444_v36 }
 0x192   :  { %v223_v39 = vpop.f32.mrf.mxu1 }
 0x193   :  { %v224_v40 = vadd.f32 %v444_v36, %v223_v39  ;;  %v233_v42 = vmax.f32 %v229_v38, 0.0 }
 0x195   :  { %v232_v41 = vmax.f32 %v224_v40, 0.0 }
 0x197   :  { %544 = vmatprep.mubr.msk.f32.mxu0 %vm249_vm2, %v232_v41 }
 0x198   :  { %545 = vmatmul.mubr.msk.f32.vlgmr.msra.gmra.mxu0 %vm249_vm2, %v233_v42 }
 0x199   :  { %551 = vmatprep.mubr.msk.f32.mxu0 %vm582_vm3, %v581_v43 }
 0x258   :  { %v546_v47 = vpop.f32.mrf.mxu0 }
 0x259   :  { %v328_v48 = vadd.f32 %v546_v47, %v445_v46 }
 0x25a   :  { %v322_v49 = vpop.f32.mrf.mxu0 }
 0x25b   :  { %v332_v50 = vmax.f32 %v328_v48, 0.0  ;;  %v323_v51 = vadd.f32 %v445_v46, %v322_v49 }
 0x25d   :  { %548 = vmatpush3.xpose.msk.msra.mxu0 %vm344_vm4, %v332_v50  ;;  %v331_v52 = vmax.f32 %v323_v51, 0.0 }
 0x25e   :  { %549 = vmatprep.subr.mxu0 %v581_v43 }
 0x261   :  { %550 = vmatpush3.xpose.msk.msra.mxu0 %vm344_vm4, %v331_v52 }
 0x264   :  { %552 = vmatmul.mubr.msk.f32.vlgmr.msra.gmra.mxu0 %vm344_vm4, %v333_v53 }
 0x324   :  { %v420_v59 = vpop.f32.mrf.mxu0 }
 0x325   :  { %v421_v60 = vadd.f32 %v420_v59, %v343_v58 }
 0x326   :  { %v553_v61 = vpop.f32.mrf.mxu0 }
 0x327   :  { %425 = vst.msk [vmem:[#allocation3] sm:$0x1] %vm424_vm5, %v421_v60 }
 0x328   :  { %570 = shalt.err (!%p567_p4)
}
 0x329   :  { %435 = dma.vmem_to_hbm [thread:$0]  %s433_s1, 16, %s746_s9, [#allocation4]  }
 0x32a   :  { %579 = dma.done.wait [#allocation4], 16  }
 0x32b   :  { %580 = vsyncadd [#allocation4], 4294967280 }
 0x32c   :  { %439 = vsyncpa [#allocation4], 1 }

</bundles_post_ra>
